<compile_context>
chip_gen: v7x
topology: tpu7x:2x2x1
jax: 0.10.0
libtpu: 0.0.40
codegen_flags: <defaults>
</compile_context>

<pallas_src>
import functools
import math

import jax
import jax.numpy as jnp
from jax import lax
from jax.experimental import pallas as pl
from jax.experimental.pallas import tpu as pltpu


# ----------------------------------------------------------------------------
# Pallas kernel: one grid step == one chunk of Tc timesteps, fully fused.
# ----------------------------------------------------------------------------
def lru_fused_kernel(u_ref, bn_re_ref, bn_im_ref, lam_ref, c_re_ref, c_im_ref,
                     d_ref, y_ref, h_re, h_im, xh_re, xh_im, *, hp, unroll):
    c = pl.program_id(1)                       # time-chunk index (sequential)

    @pl.when(c == 0)
    def _():
        h_re[...] = jnp.zeros_like(h_re)
        h_im[...] = jnp.zeros_like(h_im)

    tc, bc, d_in = u_ref.shape
    d_out = y_ref.shape[-1]
    mm_dtype = bn_re_ref.dtype                 # matmul operand dtype (bf16/f32)

    # ---- fused input projection: whole-chunk MXU matmuls, f32 accumulate ----
    u_flat = u_ref[...].reshape(tc * bc, d_in).astype(mm_dtype)
    xh_re[...] = jnp.dot(u_flat, bn_re_ref[...],
                         preferred_element_type=jnp.float32).reshape(tc, bc, hp)
    xh_im[...] = jnp.dot(u_flat, bn_im_ref[...],
                         preferred_element_type=jnp.float32).reshape(tc, bc, hp)

    # ---- sequential diagonal recurrence (f32, VPU), state kept in VMEM ----
    # Hoist the lambda broadcast out of the loop (JAX does not CSE it).
    lr = jnp.broadcast_to(lam_ref[0:1, :], (bc, hp))
    li = jnp.broadcast_to(lam_ref[1:2, :], (bc, hp))

    def step(t, carry):
        hr, hi = carry
        xr = xh_re[t]                           # (bc, hp)
        xi = xh_im[t]
        # h <- h * lambda + x_t   (complex multiply by diagonal, elementwise)
        nr = hr * lr - hi * li + xr
        ni = hr * li + hi * lr + xi
        xh_re[t] = nr                           # overwrite x with h in place
        xh_im[t] = ni
        return nr, ni

    hr_f, hi_f = lax.fori_loop(0, tc, step, (h_re[...], h_im[...]),
                               unroll=unroll)
    h_re[...] = hr_f                            # carry state to next chunk
    h_im[...] = hi_f

    # ---- fused output projection: Re(H @ C.T) + U @ D.T (chunk MXU matmuls) ----
    hr_flat = xh_re[...].reshape(tc * bc, hp).astype(mm_dtype)
    hi_flat = xh_im[...].reshape(tc * bc, hp).astype(mm_dtype)
    y = jnp.dot(hr_flat, c_re_ref[...], preferred_element_type=jnp.float32)
    y = y - jnp.dot(hi_flat, c_im_ref[...], preferred_element_type=jnp.float32)
    y = y + jnp.dot(u_flat, d_ref[...], preferred_element_type=jnp.float32)
    y_ref[...] = y.reshape(tc, bc, d_out).astype(y_ref.dtype)


# ----------------------------------------------------------------------------
# Wrapper: parameter prep + padding in XLA; everything else in the kernel.
# ----------------------------------------------------------------------------
def lru_forward_pallas(u, params, *, time_block=128, batch_block=None,
                       matmul_dtype=jnp.bfloat16):
    """u: (B, T, d_in) float32 -> (B, T, d_out) float32.

    batch_block: None -> one batch block (recommended on v5e/v6e).  On v7x
    set batch_block=B//2 (a multiple of 8) to shard the parallel batch axis
    across both TensorCores.
    """
    u = u.astype(jnp.float32)
    B, T, d_in = u.shape
    H = params["nu_log"].shape[0]
    d_out = params["D"].shape[0]

    # Pad hidden dim to a lane-dense multiple of 128 (zero-padded lambda/B/C
    # columns keep the padded state identically zero -> results unchanged).
    Hp = ((H + 127) // 128) * 128
    pad_h = Hp - H

    # ---- parameter preprocessing (plain JAX glue) ----
    lam_mod = jnp.exp(-jnp.exp(params["nu_log"]))            # |lambda|
    theta = jnp.exp(params["theta_log"])
    lam = jnp.stack([lam_mod * jnp.cos(theta),
                     lam_mod * jnp.sin(theta)], axis=0)      # (2, H) f32
    lam = jnp.pad(lam, ((0, 0), (0, pad_h)))                 # (2, Hp)

    # B_norm = diag(gamma_log) @ (B_re + i B_im) -- matches the PyTorch module,
    # which multiplies by gamma_log directly (not exp(gamma_log)).
    gamma = params["gamma_log"][:, None]
    bn_re_T = jnp.pad((gamma * params["B_re"]).T,
                      ((0, 0), (0, pad_h))).astype(matmul_dtype)   # (d_in, Hp)
    bn_im_T = jnp.pad((gamma * params["B_im"]).T,
                      ((0, 0), (0, pad_h))).astype(matmul_dtype)
    c_re_T = jnp.pad(params["C_re"].T,
                     ((0, pad_h), (0, 0))).astype(matmul_dtype)    # (Hp, d_out)
    c_im_T = jnp.pad(params["C_im"].T,
                     ((0, pad_h), (0, 0))).astype(matmul_dtype)
    d_T = params["D"].T.astype(matmul_dtype)                       # (d_in, d_out)

    # ---- time chunking (pad T up to a multiple of the chunk size) ----
    Tc = max(1, min(time_block, T))
    n_chunks = (T + Tc - 1) // Tc
    T_pad = n_chunks * Tc
    u_tm = jnp.transpose(u, (1, 0, 2))                       # (T, B, d_in)
    if T_pad != T:
        u_tm = jnp.pad(u_tm, ((0, T_pad - T), (0, 0), (0, 0)))

    Bc = B if batch_block is None else int(batch_block)
    assert B % Bc == 0, "batch_block must divide batch"
    assert Bc == B or Bc % 8 == 0, "batch_block must be a multiple of 8"
    n_batch_blocks = B // Bc

    unroll = 8 if Tc % 8 == 0 else True

    # ---- explicit VMEM budget (double-buffered I/O tiles + scratch + weights) ----
    mm_bytes = jnp.dtype(matmul_dtype).itemsize
    scratch_bytes = (2 * Bc * Hp + 2 * Tc * Bc * Hp) * 4
    io_bytes = 2 * Tc * Bc * (d_in + d_out) * 4
    w_bytes = 2 * ((2 * d_in * Hp + 2 * Hp * d_out + d_in * d_out) * mm_bytes
                   + 2 * Hp * 4)
    vmem_limit = int(min(100 * 2**20,
                         max(32 * 2**20, 2 * (scratch_bytes + io_bytes + w_bytes))))

    u_spec = pl.BlockSpec((Tc, Bc, d_in), lambda b, c: (c, b, 0))
    y_spec = pl.BlockSpec((Tc, Bc, d_out), lambda b, c: (c, b, 0))

    def const_spec(shape):
        nd = len(shape)
        return pl.BlockSpec(shape, lambda b, c, _nd=nd: (0,) * _nd)

    # NOTE: if a profile shows exposed DMA on the u input, add
    # pipeline_mode=pl.Buffered(3) to u_spec (re-check the VMEM budget first).
    y_tm = pl.pallas_call(
        functools.partial(lru_fused_kernel, hp=Hp, unroll=unroll),
        out_shape=jax.ShapeDtypeStruct((T_pad, B, d_out), jnp.float32),
        grid_spec=pltpu.PrefetchScalarGridSpec(
            num_scalar_prefetch=0,
            grid=(n_batch_blocks, n_chunks),
            in_specs=[u_spec,                                  # u (time-major)
                      const_spec((d_in, Hp)),                  # B_norm re^T
                      const_spec((d_in, Hp)),                  # B_norm im^T
                      const_spec((2, Hp)),                     # lambda (re, im)
                      const_spec((Hp, d_out)),                 # C_re^T
                      const_spec((Hp, d_out)),                 # C_im^T
                      const_spec((d_in, d_out))],              # D^T
            out_specs=y_spec,
            scratch_shapes=[
                pltpu.VMEM((Bc, Hp), jnp.float32),             # h_re carry
                pltpu.VMEM((Bc, Hp), jnp.float32),             # h_im carry
                pltpu.VMEM((Tc, Bc, Hp), jnp.float32),         # x/h re (reused)
                pltpu.VMEM((Tc, Bc, Hp), jnp.float32),         # x/h im (reused)
            ],
        ),
        compiler_params=pltpu.CompilerParams(
            # time axis is a strict recurrence -> "arbitrary";
            # batch axis is data-parallel (megacore sharding on v7x).
            dimension_semantics=("parallel", "arbitrary"),
            vmem_limit_bytes=vmem_limit,
        ),
    )(u_tm, bn_re_T, bn_im_T, lam, c_re_T, c_im_T, d_T)

    return jnp.transpose(y_tm[:T], (1, 0, 2))                 # (B, T, d_out)


# ----------------------------------------------------------------------------
# Deterministic parameter init (mirrors LRU._init_params semantics)
# ----------------------------------------------------------------------------
def init_lru_params(key, d_in, d_hidden, d_out,
                    r_min=0.0, r_max=1.0, max_phase=6.28):
    ks = jax.random.split(key, 7)

    theta_log = jax.random.uniform(ks[0], (d_hidden,), minval=0.0, maxval=max_phase)
    u = jax.random.uniform(ks[1], (d_hidden,))
    nu_log = jnp.log(-0.5 * jnp.log(u * (r_max ** 2 - r_min ** 2) + r_min ** 2))
    lam_abs_sq = jnp.exp(-2.0 * jnp.exp(nu_log))              # |lambda|^2
    gamma_log = jnp.log(jnp.sqrt(1.0 - lam_abs_sq))

    def xavier_normal(k, shape):
        fan_out, fan_in = shape
        std = math.sqrt(2.0 / (fan_in + fan_out))
        return std * jax.random.normal(k, shape, dtype=jnp.float32)

    return {
        "theta_log": theta_log.astype(jnp.float32),
        "nu_log": nu_log.astype(jnp.float32),
        "gamma_log": gamma_log.astype(jnp.float32),
        "B_re": xavier_normal(ks[2], (d_hidden, d_in)),
        "B_im": xavier_normal(ks[3], (d_hidden, d_in)),
        "C_re": xavier_normal(ks[4], (d_out, d_hidden)),
        "C_im": xavier_normal(ks[5], (d_out, d_hidden)),
        "D": xavier_normal(ks[6], (d_out, d_in)),
    }


# ----------------------------------------------------------------------------
# Pure-JAX reference (mirrors the PyTorch forward) for verification
# ----------------------------------------------------------------------------
def lru_forward_ref(u, params):
    diag_lambda = jnp.exp(-jnp.exp(params["nu_log"]) + 1j * jnp.exp(params["theta_log"]))
    B_norm = params["gamma_log"][:, None].astype(jnp.complex64) * (
        params["B_re"] + 1j * params["B_im"])
    C = params["C_re"] + 1j * params["C_im"]
    B, T, _ = u.shape
    h = jnp.zeros((B, params["nu_log"].shape[0]), dtype=jnp.complex64)
    ys = []
    for t in range(T):
        h = h * diag_lambda + u[:, t].astype(jnp.complex64) @ B_norm.T
        y = jnp.real(h @ C.T) + u[:, t] @ params["D"].T
        ys.append(y)
    return jnp.stack(ys, axis=1)


if __name__ == "__main__":
    d_in, d_hidden, d_out = 4, 32, 4
    batch, seq = 2, 8

    key = jax.random.PRNGKey(0)
    kp, ku = jax.random.split(key)
    params = init_lru_params(kp, d_in, d_hidden, d_out)
    u = jax.random.normal(ku, (batch, seq, d_in), dtype=jnp.float32)

    ref = lru_forward_ref(u, params)

    # Strict check: f32 matmul operands (exact-ish vs the f32/complex64 ref).
    out = lru_forward_pallas(u, params, matmul_dtype=jnp.float32)
    jax.block_until_ready(out)
    assert out.shape == (batch, seq, d_out)
    assert jnp.allclose(out, ref, atol=1e-4, rtol=1e-4), "mismatch vs reference (f32)"

    # Performance path: bf16 matmul operands with f32 accumulation (default).
    out_bf16 = lru_forward_pallas(u, params)
    jax.block_until_ready(out_bf16)
    assert out_bf16.shape == (batch, seq, d_out)
    assert jnp.allclose(out_bf16, ref, atol=1e-1, rtol=1e-1), "mismatch vs reference (bf16)"

    print("KERNEL_OK")
</pallas_src>

<mosaic_0001>
module attributes {stable_mosaic.version = 11 : i64} {
  func.func @lru_fused_kernel(%arg0: i32, %arg1: i32, %arg2: memref<8x2x4xf32, #tpu.memory_space<vmem>>, %arg3: memref<4x128xf32, #tpu.memory_space<vmem>>, %arg4: memref<4x128xf32, #tpu.memory_space<vmem>>, %arg5: memref<2x128xf32, #tpu.memory_space<vmem>>, %arg6: memref<128x4xf32, #tpu.memory_space<vmem>>, %arg7: memref<128x4xf32, #tpu.memory_space<vmem>>, %arg8: memref<4x4xf32, #tpu.memory_space<vmem>>, %arg9: memref<8x2x4xf32, #tpu.memory_space<vmem>>, %arg10: memref<2x128xf32, #tpu.memory_space<vmem>>, %arg11: memref<2x128xf32, #tpu.memory_space<vmem>>, %arg12: memref<8x2x128xf32, #tpu.memory_space<vmem>>, %arg13: memref<8x2x128xf32, #tpu.memory_space<vmem>>) attributes {dimension_semantics = [#tpu.dimension_semantics<parallel>, #tpu.dimension_semantics<arbitrary>], iteration_bounds = array<i64: 1, 1>, scalar_prefetch = 0 : i64, scratch_operands = 4 : i64, tpu.core_type = #tpu.core_type<tc>, window_params = [{transform_indices = @transform_0, window_bounds = array<i64: 8, 2, 4>}, {pipeline_mode = #tpu.pipeline_mode<synchronous>, transform_indices = @transform_1, window_bounds = array<i64: 4, 128>}, {pipeline_mode = #tpu.pipeline_mode<synchronous>, transform_indices = @transform_2, window_bounds = array<i64: 4, 128>}, {pipeline_mode = #tpu.pipeline_mode<synchronous>, transform_indices = @transform_3, window_bounds = array<i64: 2, 128>}, {pipeline_mode = #tpu.pipeline_mode<synchronous>, transform_indices = @transform_4, window_bounds = array<i64: 128, 4>}, {pipeline_mode = #tpu.pipeline_mode<synchronous>, transform_indices = @transform_5, window_bounds = array<i64: 128, 4>}, {pipeline_mode = #tpu.pipeline_mode<synchronous>, transform_indices = @transform_6, window_bounds = array<i64: 4, 4>}, {transform_indices = @transform_7, window_bounds = array<i64: 8, 2, 4>}]} {
    %c0_i32 = arith.constant 0 : i32
    %0 = arith.cmpi eq, %arg1, %c0_i32 : i32
    %1 = arith.extui %0 : i1 to i32
    %c0_i32_0 = arith.constant 0 : i32
    %2 = arith.cmpi ne, %1, %c0_i32_0 : i32
    scf.if %2 {
      %cst_108 = arith.constant 0.000000e+00 : f32
      %213 = vector.broadcast %cst_108 : f32 to vector<2x128xf32>
      %c0_109 = arith.constant 0 : index
      %c0_110 = arith.constant 0 : index
      %214 = vector.load %arg10[%c0_109, %c0_110] : memref<2x128xf32, #tpu.memory_space<vmem>>, vector<2x128xf32>
      tpu.vector_store %arg10[%c0_109, %c0_110], %213 {strides = array<i32>} : memref<2x128xf32, #tpu.memory_space<vmem>>, vector<2x128xf32>,
      %cst_111 = arith.constant 0.000000e+00 : f32
      %215 = vector.broadcast %cst_111 : f32 to vector<2x128xf32>
      %c0_112 = arith.constant 0 : index
      %c0_113 = arith.constant 0 : index
      %216 = vector.load %arg11[%c0_112, %c0_113] : memref<2x128xf32, #tpu.memory_space<vmem>>, vector<2x128xf32>
      tpu.vector_store %arg11[%c0_112, %c0_113], %215 {strides = array<i32>} : memref<2x128xf32, #tpu.memory_space<vmem>>, vector<2x128xf32>,
    } else {
    }
    %c0 = arith.constant 0 : index
    %c0_1 = arith.constant 0 : index
    %c0_2 = arith.constant 0 : index
    %3 = vector.load %arg2[%c0, %c0_1, %c0_2] : memref<8x2x4xf32, #tpu.memory_space<vmem>>, vector<8x2x4xf32>
    %4 = vector.shape_cast %3 : vector<8x2x4xf32> to vector<16x4xf32>
    %c0_3 = arith.constant 0 : index
    %c0_4 = arith.constant 0 : index
    %5 = vector.load %arg3[%c0_3, %c0_4] : memref<4x128xf32, #tpu.memory_space<vmem>>, vector<4x128xf32>
    %cst = arith.constant dense<0.000000e+00> : vector<16x128xf32>
    %6 = tpu.matmul %4, %5, %cst {dimension_numbers = #tpu.dot_dimension_numbers<[1], [0], [0], [1], [0, 0, 1, 1], [], []>} : vector<16x4xf32>, vector<4x128xf32>, vector<16x128xf32> -> vector<16x128xf32>
    %7 = vector.shape_cast %6 : vector<16x128xf32> to vector<8x2x128xf32>
    %c0_5 = arith.constant 0 : index
    %c0_6 = arith.constant 0 : index
    %c0_7 = arith.constant 0 : index
    %8 = vector.load %arg12[%c0_5, %c0_6, %c0_7] : memref<8x2x128xf32, #tpu.memory_space<vmem>>, vector<8x2x128xf32>
    tpu.vector_store %arg12[%c0_5, %c0_6, %c0_7], %7 {strides = array<i32>} : memref<8x2x128xf32, #tpu.memory_space<vmem>>, vector<8x2x128xf32>,
    %c0_8 = arith.constant 0 : index
    %c0_9 = arith.constant 0 : index
    %9 = vector.load %arg4[%c0_8, %c0_9] : memref<4x128xf32, #tpu.memory_space<vmem>>, vector<4x128xf32>
    %cst_10 = arith.constant dense<0.000000e+00> : vector<16x128xf32>
    %10 = tpu.matmul %4, %9, %cst_10 {dimension_numbers = #tpu.dot_dimension_numbers<[1], [0], [0], [1], [0, 0, 1, 1], [], []>} : vector<16x4xf32>, vector<4x128xf32>, vector<16x128xf32> -> vector<16x128xf32>
    %11 = vector.shape_cast %10 : vector<16x128xf32> to vector<8x2x128xf32>
    %c0_11 = arith.constant 0 : index
    %c0_12 = arith.constant 0 : index
    %c0_13 = arith.constant 0 : index
    %12 = vector.load %arg13[%c0_11, %c0_12, %c0_13] : memref<8x2x128xf32, #tpu.memory_space<vmem>>, vector<8x2x128xf32>
    tpu.vector_store %arg13[%c0_11, %c0_12, %c0_13], %11 {strides = array<i32>} : memref<8x2x128xf32, #tpu.memory_space<vmem>>, vector<8x2x128xf32>,
    %c0_14 = arith.constant 0 : index
    %c0_15 = arith.constant 0 : index
    %13 = vector.load %arg5[%c0_14, %c0_15] : memref<2x128xf32, #tpu.memory_space<vmem>>, vector<1x128xf32>
    %14 = vector.shape_cast %13 : vector<1x128xf32> to vector<1x128xf32>
    %15 = vector.broadcast %14 : vector<1x128xf32> to vector<2x128xf32>
    %c1 = arith.constant 1 : index
    %c0_16 = arith.constant 0 : index
    %16 = vector.load %arg5[%c1, %c0_16] : memref<2x128xf32, #tpu.memory_space<vmem>>, vector<1x128xf32>
    %17 = vector.shape_cast %16 : vector<1x128xf32> to vector<1x128xf32>
    %18 = vector.broadcast %17 : vector<1x128xf32> to vector<2x128xf32>
    %c0_17 = arith.constant 0 : index
    %c0_18 = arith.constant 0 : index
    %19 = vector.load %arg10[%c0_17, %c0_18] : memref<2x128xf32, #tpu.memory_space<vmem>>, vector<2x128xf32>
    %c0_19 = arith.constant 0 : index
    %c0_20 = arith.constant 0 : index
    %20 = vector.load %arg11[%c0_19, %c0_20] : memref<2x128xf32, #tpu.memory_space<vmem>>, vector<2x128xf32>
    %c0_i32_21 = arith.constant 0 : i32
    %21 = arith.index_cast %c0_i32_21 : i32 to index
    %c0_22 = arith.constant 0 : index
    %c0_23 = arith.constant 0 : index
    %22 = vector.load %arg12[%21, %c0_22, %c0_23] : memref<8x2x128xf32, #tpu.memory_space<vmem>>, vector<1x2x128xf32>
    %23 = vector.shape_cast %22 : vector<1x2x128xf32> to vector<2x128xf32>
    %24 = arith.index_cast %c0_i32_21 : i32 to index
    %c0_24 = arith.constant 0 : index
    %c0_25 = arith.constant 0 : index
    %25 = vector.load %arg13[%24, %c0_24, %c0_25] : memref<8x2x128xf32, #tpu.memory_space<vmem>>, vector<1x2x128xf32>
    %26 = vector.shape_cast %25 : vector<1x2x128xf32> to vector<2x128xf32>
    %27 = arith.mulf %19, %15 : vector<2x128xf32>
    %28 = arith.mulf %20, %18 : vector<2x128xf32>
    %29 = arith.subf %27, %28 : vector<2x128xf32>
    %30 = arith.addf %29, %23 : vector<2x128xf32>
    %31 = arith.mulf %19, %18 : vector<2x128xf32>
    %32 = arith.mulf %20, %15 : vector<2x128xf32>
    %33 = arith.addf %31, %32 : vector<2x128xf32>
    %34 = arith.addf %33, %26 : vector<2x128xf32>
    %35 = arith.index_cast %c0_i32_21 : i32 to index
    %c0_26 = arith.constant 0 : index
    %c0_27 = arith.constant 0 : index
    %36 = vector.load %arg12[%35, %c0_26, %c0_27] : memref<8x2x128xf32, #tpu.memory_space<vmem>>, vector<1x2x128xf32>
    %37 = vector.shape_cast %36 : vector<1x2x128xf32> to vector<2x128xf32>
    %38 = vector.shape_cast %30 : vector<2x128xf32> to vector<1x2x128xf32>
    tpu.vector_store %arg12[%35, %c0_26, %c0_27], %38 {strides = array<i32>} : memref<8x2x128xf32, #tpu.memory_space<vmem>>, vector<1x2x128xf32>,
    %39 = arith.index_cast %c0_i32_21 : i32 to index
    %c0_28 = arith.constant 0 : index
    %c0_29 = arith.constant 0 : index
    %40 = vector.load %arg13[%39, %c0_28, %c0_29] : memref<8x2x128xf32, #tpu.memory_space<vmem>>, vector<1x2x128xf32>
    %41 = vector.shape_cast %40 : vector<1x2x128xf32> to vector<2x128xf32>
    %42 = vector.shape_cast %34 : vector<2x128xf32> to vector<1x2x128xf32>
    tpu.vector_store %arg13[%39, %c0_28, %c0_29], %42 {strides = array<i32>} : memref<8x2x128xf32, #tpu.memory_space<vmem>>, vector<1x2x128xf32>,
    %c1_i32 = arith.constant 1 : i32
    %43 = arith.index_cast %c1_i32 : i32 to index
    %c0_30 = arith.constant 0 : index
    %c0_31 = arith.constant 0 : index
    %44 = vector.load %arg12[%43, %c0_30, %c0_31] : memref<8x2x128xf32, #tpu.memory_space<vmem>>, vector<1x2x128xf32>
    %45 = vector.shape_cast %44 : vector<1x2x128xf32> to vector<2x128xf32>
    %46 = arith.index_cast %c1_i32 : i32 to index
    %c0_32 = arith.constant 0 : index
    %c0_33 = arith.constant 0 : index
    %47 = vector.load %arg13[%46, %c0_32, %c0_33] : memref<8x2x128xf32, #tpu.memory_space<vmem>>, vector<1x2x128xf32>
    %48 = vector.shape_cast %47 : vector<1x2x128xf32> to vector<2x128xf32>
    %49 = arith.mulf %30, %15 : vector<2x128xf32>
    %50 = arith.mulf %34, %18 : vector<2x128xf32>
    %51 = arith.subf %49, %50 : vector<2x128xf32>
    %52 = arith.addf %51, %45 : vector<2x128xf32>
    %53 = arith.mulf %30, %18 : vector<2x128xf32>
    %54 = arith.mulf %34, %15 : vector<2x128xf32>
    %55 = arith.addf %53, %54 : vector<2x128xf32>
    %56 = arith.addf %55, %48 : vector<2x128xf32>
    %57 = arith.index_cast %c1_i32 : i32 to index
    %c0_34 = arith.constant 0 : index
    %c0_35 = arith.constant 0 : index
    %58 = vector.load %arg12[%57, %c0_34, %c0_35] : memref<8x2x128xf32, #tpu.memory_space<vmem>>, vector<1x2x128xf32>
    %59 = vector.shape_cast %58 : vector<1x2x128xf32> to vector<2x128xf32>
    %60 = vector.shape_cast %52 : vector<2x128xf32> to vector<1x2x128xf32>
    tpu.vector_store %arg12[%57, %c0_34, %c0_35], %60 {strides = array<i32>} : memref<8x2x128xf32, #tpu.memory_space<vmem>>, vector<1x2x128xf32>,
    %61 = arith.index_cast %c1_i32 : i32 to index
    %c0_36 = arith.constant 0 : index
    %c0_37 = arith.constant 0 : index
    %62 = vector.load %arg13[%61, %c0_36, %c0_37] : memref<8x2x128xf32, #tpu.memory_space<vmem>>, vector<1x2x128xf32>
    %63 = vector.shape_cast %62 : vector<1x2x128xf32> to vector<2x128xf32>
    %64 = vector.shape_cast %56 : vector<2x128xf32> to vector<1x2x128xf32>
    tpu.vector_store %arg13[%61, %c0_36, %c0_37], %64 {strides = array<i32>} : memref<8x2x128xf32, #tpu.memory_space<vmem>>, vector<1x2x128xf32>,
    %c2_i32 = arith.constant 2 : i32
    %65 = arith.index_cast %c2_i32 : i32 to index
    %c0_38 = arith.constant 0 : index
    %c0_39 = arith.constant 0 : index
    %66 = vector.load %arg12[%65, %c0_38, %c0_39] : memref<8x2x128xf32, #tpu.memory_space<vmem>>, vector<1x2x128xf32>
    %67 = vector.shape_cast %66 : vector<1x2x128xf32> to vector<2x128xf32>
    %68 = arith.index_cast %c2_i32 : i32 to index
    %c0_40 = arith.constant 0 : index
    %c0_41 = arith.constant 0 : index
    %69 = vector.load %arg13[%68, %c0_40, %c0_41] : memref<8x2x128xf32, #tpu.memory_space<vmem>>, vector<1x2x128xf32>
    %70 = vector.shape_cast %69 : vector<1x2x128xf32> to vector<2x128xf32>
    %71 = arith.mulf %52, %15 : vector<2x128xf32>
    %72 = arith.mulf %56, %18 : vector<2x128xf32>
    %73 = arith.subf %71, %72 : vector<2x128xf32>
    %74 = arith.addf %73, %67 : vector<2x128xf32>
    %75 = arith.mulf %52, %18 : vector<2x128xf32>
    %76 = arith.mulf %56, %15 : vector<2x128xf32>
    %77 = arith.addf %75, %76 : vector<2x128xf32>
    %78 = arith.addf %77, %70 : vector<2x128xf32>
    %79 = arith.index_cast %c2_i32 : i32 to index
    %c0_42 = arith.constant 0 : index
    %c0_43 = arith.constant 0 : index
    %80 = vector.load %arg12[%79, %c0_42, %c0_43] : memref<8x2x128xf32, #tpu.memory_space<vmem>>, vector<1x2x128xf32>
    %81 = vector.shape_cast %80 : vector<1x2x128xf32> to vector<2x128xf32>
    %82 = vector.shape_cast %74 : vector<2x128xf32> to vector<1x2x128xf32>
    tpu.vector_store %arg12[%79, %c0_42, %c0_43], %82 {strides = array<i32>} : memref<8x2x128xf32, #tpu.memory_space<vmem>>, vector<1x2x128xf32>,
    %83 = arith.index_cast %c2_i32 : i32 to index
    %c0_44 = arith.constant 0 : index
    %c0_45 = arith.constant 0 : index
    %84 = vector.load %arg13[%83, %c0_44, %c0_45] : memref<8x2x128xf32, #tpu.memory_space<vmem>>, vector<1x2x128xf32>
    %85 = vector.shape_cast %84 : vector<1x2x128xf32> to vector<2x128xf32>
    %86 = vector.shape_cast %78 : vector<2x128xf32> to vector<1x2x128xf32>
    tpu.vector_store %arg13[%83, %c0_44, %c0_45], %86 {strides = array<i32>} : memref<8x2x128xf32, #tpu.memory_space<vmem>>, vector<1x2x128xf32>,
    %c3_i32 = arith.constant 3 : i32
    %87 = arith.index_cast %c3_i32 : i32 to index
    %c0_46 = arith.constant 0 : index
    %c0_47 = arith.constant 0 : index
    %88 = vector.load %arg12[%87, %c0_46, %c0_47] : memref<8x2x128xf32, #tpu.memory_space<vmem>>, vector<1x2x128xf32>
    %89 = vector.shape_cast %88 : vector<1x2x128xf32> to vector<2x128xf32>
    %90 = arith.index_cast %c3_i32 : i32 to index
    %c0_48 = arith.constant 0 : index
    %c0_49 = arith.constant 0 : index
    %91 = vector.load %arg13[%90, %c0_48, %c0_49] : memref<8x2x128xf32, #tpu.memory_space<vmem>>, vector<1x2x128xf32>
    %92 = vector.shape_cast %91 : vector<1x2x128xf32> to vector<2x128xf32>
    %93 = arith.mulf %74, %15 : vector<2x128xf32>
    %94 = arith.mulf %78, %18 : vector<2x128xf32>
    %95 = arith.subf %93, %94 : vector<2x128xf32>
    %96 = arith.addf %95, %89 : vector<2x128xf32>
    %97 = arith.mulf %74, %18 : vector<2x128xf32>
    %98 = arith.mulf %78, %15 : vector<2x128xf32>
    %99 = arith.addf %97, %98 : vector<2x128xf32>
    %100 = arith.addf %99, %92 : vector<2x128xf32>
    %101 = arith.index_cast %c3_i32 : i32 to index
    %c0_50 = arith.constant 0 : index
    %c0_51 = arith.constant 0 : index
    %102 = vector.load %arg12[%101, %c0_50, %c0_51] : memref<8x2x128xf32, #tpu.memory_space<vmem>>, vector<1x2x128xf32>
    %103 = vector.shape_cast %102 : vector<1x2x128xf32> to vector<2x128xf32>
    %104 = vector.shape_cast %96 : vector<2x128xf32> to vector<1x2x128xf32>
    tpu.vector_store %arg12[%101, %c0_50, %c0_51], %104 {strides = array<i32>} : memref<8x2x128xf32, #tpu.memory_space<vmem>>, vector<1x2x128xf32>,
    %105 = arith.index_cast %c3_i32 : i32 to index
    %c0_52 = arith.constant 0 : index
    %c0_53 = arith.constant 0 : index
    %106 = vector.load %arg13[%105, %c0_52, %c0_53] : memref<8x2x128xf32, #tpu.memory_space<vmem>>, vector<1x2x128xf32>
    %107 = vector.shape_cast %106 : vector<1x2x128xf32> to vector<2x128xf32>
    %108 = vector.shape_cast %100 : vector<2x128xf32> to vector<1x2x128xf32>
    tpu.vector_store %arg13[%105, %c0_52, %c0_53], %108 {strides = array<i32>} : memref<8x2x128xf32, #tpu.memory_space<vmem>>, vector<1x2x128xf32>,
    %c4_i32 = arith.constant 4 : i32
    %109 = arith.index_cast %c4_i32 : i32 to index
    %c0_54 = arith.constant 0 : index
    %c0_55 = arith.constant 0 : index
    %110 = vector.load %arg12[%109, %c0_54, %c0_55] : memref<8x2x128xf32, #tpu.memory_space<vmem>>, vector<1x2x128xf32>
    %111 = vector.shape_cast %110 : vector<1x2x128xf32> to vector<2x128xf32>
    %112 = arith.index_cast %c4_i32 : i32 to index
    %c0_56 = arith.constant 0 : index
    %c0_57 = arith.constant 0 : index
    %113 = vector.load %arg13[%112, %c0_56, %c0_57] : memref<8x2x128xf32, #tpu.memory_space<vmem>>, vector<1x2x128xf32>
    %114 = vector.shape_cast %113 : vector<1x2x128xf32> to vector<2x128xf32>
    %115 = arith.mulf %96, %15 : vector<2x128xf32>
    %116 = arith.mulf %100, %18 : vector<2x128xf32>
    %117 = arith.subf %115, %116 : vector<2x128xf32>
    %118 = arith.addf %117, %111 : vector<2x128xf32>
    %119 = arith.mulf %96, %18 : vector<2x128xf32>
    %120 = arith.mulf %100, %15 : vector<2x128xf32>
    %121 = arith.addf %119, %120 : vector<2x128xf32>
    %122 = arith.addf %121, %114 : vector<2x128xf32>
    %123 = arith.index_cast %c4_i32 : i32 to index
    %c0_58 = arith.constant 0 : index
    %c0_59 = arith.constant 0 : index
    %124 = vector.load %arg12[%123, %c0_58, %c0_59] : memref<8x2x128xf32, #tpu.memory_space<vmem>>, vector<1x2x128xf32>
    %125 = vector.shape_cast %124 : vector<1x2x128xf32> to vector<2x128xf32>
    %126 = vector.shape_cast %118 : vector<2x128xf32> to vector<1x2x128xf32>
    tpu.vector_store %arg12[%123, %c0_58, %c0_59], %126 {strides = array<i32>} : memref<8x2x128xf32, #tpu.memory_space<vmem>>, vector<1x2x128xf32>,
    %127 = arith.index_cast %c4_i32 : i32 to index
    %c0_60 = arith.constant 0 : index
    %c0_61 = arith.constant 0 : index
    %128 = vector.load %arg13[%127, %c0_60, %c0_61] : memref<8x2x128xf32, #tpu.memory_space<vmem>>, vector<1x2x128xf32>
    %129 = vector.shape_cast %128 : vector<1x2x128xf32> to vector<2x128xf32>
    %130 = vector.shape_cast %122 : vector<2x128xf32> to vector<1x2x128xf32>
    tpu.vector_store %arg13[%127, %c0_60, %c0_61], %130 {strides = array<i32>} : memref<8x2x128xf32, #tpu.memory_space<vmem>>, vector<1x2x128xf32>,
    %c5_i32 = arith.constant 5 : i32
    %131 = arith.index_cast %c5_i32 : i32 to index
    %c0_62 = arith.constant 0 : index
    %c0_63 = arith.constant 0 : index
    %132 = vector.load %arg12[%131, %c0_62, %c0_63] : memref<8x2x128xf32, #tpu.memory_space<vmem>>, vector<1x2x128xf32>
    %133 = vector.shape_cast %132 : vector<1x2x128xf32> to vector<2x128xf32>
    %134 = arith.index_cast %c5_i32 : i32 to index
    %c0_64 = arith.constant 0 : index
    %c0_65 = arith.constant 0 : index
    %135 = vector.load %arg13[%134, %c0_64, %c0_65] : memref<8x2x128xf32, #tpu.memory_space<vmem>>, vector<1x2x128xf32>
    %136 = vector.shape_cast %135 : vector<1x2x128xf32> to vector<2x128xf32>
    %137 = arith.mulf %118, %15 : vector<2x128xf32>
    %138 = arith.mulf %122, %18 : vector<2x128xf32>
    %139 = arith.subf %137, %138 : vector<2x128xf32>
    %140 = arith.addf %139, %133 : vector<2x128xf32>
    %141 = arith.mulf %118, %18 : vector<2x128xf32>
    %142 = arith.mulf %122, %15 : vector<2x128xf32>
    %143 = arith.addf %141, %142 : vector<2x128xf32>
    %144 = arith.addf %143, %136 : vector<2x128xf32>
    %145 = arith.index_cast %c5_i32 : i32 to index
    %c0_66 = arith.constant 0 : index
    %c0_67 = arith.constant 0 : index
    %146 = vector.load %arg12[%145, %c0_66, %c0_67] : memref<8x2x128xf32, #tpu.memory_space<vmem>>, vector<1x2x128xf32>
    %147 = vector.shape_cast %146 : vector<1x2x128xf32> to vector<2x128xf32>
    %148 = vector.shape_cast %140 : vector<2x128xf32> to vector<1x2x128xf32>
    tpu.vector_store %arg12[%145, %c0_66, %c0_67], %148 {strides = array<i32>} : memref<8x2x128xf32, #tpu.memory_space<vmem>>, vector<1x2x128xf32>,
    %149 = arith.index_cast %c5_i32 : i32 to index
    %c0_68 = arith.constant 0 : index
    %c0_69 = arith.constant 0 : index
    %150 = vector.load %arg13[%149, %c0_68, %c0_69] : memref<8x2x128xf32, #tpu.memory_space<vmem>>, vector<1x2x128xf32>
    %151 = vector.shape_cast %150 : vector<1x2x128xf32> to vector<2x128xf32>
    %152 = vector.shape_cast %144 : vector<2x128xf32> to vector<1x2x128xf32>
    tpu.vector_store %arg13[%149, %c0_68, %c0_69], %152 {strides = array<i32>} : memref<8x2x128xf32, #tpu.memory_space<vmem>>, vector<1x2x128xf32>,
    %c6_i32 = arith.constant 6 : i32
    %153 = arith.index_cast %c6_i32 : i32 to index
    %c0_70 = arith.constant 0 : index
    %c0_71 = arith.constant 0 : index
    %154 = vector.load %arg12[%153, %c0_70, %c0_71] : memref<8x2x128xf32, #tpu.memory_space<vmem>>, vector<1x2x128xf32>
    %155 = vector.shape_cast %154 : vector<1x2x128xf32> to vector<2x128xf32>
    %156 = arith.index_cast %c6_i32 : i32 to index
    %c0_72 = arith.constant 0 : index
    %c0_73 = arith.constant 0 : index
    %157 = vector.load %arg13[%156, %c0_72, %c0_73] : memref<8x2x128xf32, #tpu.memory_space<vmem>>, vector<1x2x128xf32>
    %158 = vector.shape_cast %157 : vector<1x2x128xf32> to vector<2x128xf32>
    %159 = arith.mulf %140, %15 : vector<2x128xf32>
    %160 = arith.mulf %144, %18 : vector<2x128xf32>
    %161 = arith.subf %159, %160 : vector<2x128xf32>
    %162 = arith.addf %161, %155 : vector<2x128xf32>
    %163 = arith.mulf %140, %18 : vector<2x128xf32>
    %164 = arith.mulf %144, %15 : vector<2x128xf32>
    %165 = arith.addf %163, %164 : vector<2x128xf32>
    %166 = arith.addf %165, %158 : vector<2x128xf32>
    %167 = arith.index_cast %c6_i32 : i32 to index
    %c0_74 = arith.constant 0 : index
    %c0_75 = arith.constant 0 : index
    %168 = vector.load %arg12[%167, %c0_74, %c0_75] : memref<8x2x128xf32, #tpu.memory_space<vmem>>, vector<1x2x128xf32>
    %169 = vector.shape_cast %168 : vector<1x2x128xf32> to vector<2x128xf32>
    %170 = vector.shape_cast %162 : vector<2x128xf32> to vector<1x2x128xf32>
    tpu.vector_store %arg12[%167, %c0_74, %c0_75], %170 {strides = array<i32>} : memref<8x2x128xf32, #tpu.memory_space<vmem>>, vector<1x2x128xf32>,
    %171 = arith.index_cast %c6_i32 : i32 to index
    %c0_76 = arith.constant 0 : index
    %c0_77 = arith.constant 0 : index
    %172 = vector.load %arg13[%171, %c0_76, %c0_77] : memref<8x2x128xf32, #tpu.memory_space<vmem>>, vector<1x2x128xf32>
    %173 = vector.shape_cast %172 : vector<1x2x128xf32> to vector<2x128xf32>
    %174 = vector.shape_cast %166 : vector<2x128xf32> to vector<1x2x128xf32>
    tpu.vector_store %arg13[%171, %c0_76, %c0_77], %174 {strides = array<i32>} : memref<8x2x128xf32, #tpu.memory_space<vmem>>, vector<1x2x128xf32>,
    %c7_i32 = arith.constant 7 : i32
    %175 = arith.index_cast %c7_i32 : i32 to index
    %c0_78 = arith.constant 0 : index
    %c0_79 = arith.constant 0 : index
    %176 = vector.load %arg12[%175, %c0_78, %c0_79] : memref<8x2x128xf32, #tpu.memory_space<vmem>>, vector<1x2x128xf32>
    %177 = vector.shape_cast %176 : vector<1x2x128xf32> to vector<2x128xf32>
    %178 = arith.index_cast %c7_i32 : i32 to index
    %c0_80 = arith.constant 0 : index
    %c0_81 = arith.constant 0 : index
    %179 = vector.load %arg13[%178, %c0_80, %c0_81] : memref<8x2x128xf32, #tpu.memory_space<vmem>>, vector<1x2x128xf32>
    %180 = vector.shape_cast %179 : vector<1x2x128xf32> to vector<2x128xf32>
    %181 = arith.mulf %162, %15 : vector<2x128xf32>
    %182 = arith.mulf %166, %18 : vector<2x128xf32>
    %183 = arith.subf %181, %182 : vector<2x128xf32>
    %184 = arith.addf %183, %177 : vector<2x128xf32>
    %185 = arith.mulf %162, %18 : vector<2x128xf32>
    %186 = arith.mulf %166, %15 : vector<2x128xf32>
    %187 = arith.addf %185, %186 : vector<2x128xf32>
    %188 = arith.addf %187, %180 : vector<2x128xf32>
    %189 = arith.index_cast %c7_i32 : i32 to index
    %c0_82 = arith.constant 0 : index
    %c0_83 = arith.constant 0 : index
    %190 = vector.load %arg12[%189, %c0_82, %c0_83] : memref<8x2x128xf32, #tpu.memory_space<vmem>>, vector<1x2x128xf32>
    %191 = vector.shape_cast %190 : vector<1x2x128xf32> to vector<2x128xf32>
    %192 = vector.shape_cast %184 : vector<2x128xf32> to vector<1x2x128xf32>
    tpu.vector_store %arg12[%189, %c0_82, %c0_83], %192 {strides = array<i32>} : memref<8x2x128xf32, #tpu.memory_space<vmem>>, vector<1x2x128xf32>,
    %193 = arith.index_cast %c7_i32 : i32 to index
    %c0_84 = arith.constant 0 : index
    %c0_85 = arith.constant 0 : index
    %194 = vector.load %arg13[%193, %c0_84, %c0_85] : memref<8x2x128xf32, #tpu.memory_space<vmem>>, vector<1x2x128xf32>
    %195 = vector.shape_cast %194 : vector<1x2x128xf32> to vector<2x128xf32>
    %196 = vector.shape_cast %188 : vector<2x128xf32> to vector<1x2x128xf32>
    tpu.vector_store %arg13[%193, %c0_84, %c0_85], %196 {strides = array<i32>} : memref<8x2x128xf32, #tpu.memory_space<vmem>>, vector<1x2x128xf32>,
    %c8_i32 = arith.constant 8 : i32
    %c0_86 = arith.constant 0 : index
    %c0_87 = arith.constant 0 : index
    %197 = vector.load %arg10[%c0_86, %c0_87] : memref<2x128xf32, #tpu.memory_space<vmem>>, vector<2x128xf32>
    tpu.vector_store %arg10[%c0_86, %c0_87], %184 {strides = array<i32>} : memref<2x128xf32, #tpu.memory_space<vmem>>, vector<2x128xf32>,
    %c0_88 = arith.constant 0 : index
    %c0_89 = arith.constant 0 : index
    %198 = vector.load %arg11[%c0_88, %c0_89] : memref<2x128xf32, #tpu.memory_space<vmem>>, vector<2x128xf32>
    tpu.vector_store %arg11[%c0_88, %c0_89], %188 {strides = array<i32>} : memref<2x128xf32, #tpu.memory_space<vmem>>, vector<2x128xf32>,
    %c0_90 = arith.constant 0 : index
    %c0_91 = arith.constant 0 : index
    %c0_92 = arith.constant 0 : index
    %199 = vector.load %arg12[%c0_90, %c0_91, %c0_92] : memref<8x2x128xf32, #tpu.memory_space<vmem>>, vector<8x2x128xf32>
    %200 = vector.shape_cast %199 : vector<8x2x128xf32> to vector<16x128xf32>
    %c0_93 = arith.constant 0 : index
    %c0_94 = arith.constant 0 : index
    %c0_95 = arith.constant 0 : index
    %201 = vector.load %arg13[%c0_93, %c0_94, %c0_95] : memref<8x2x128xf32, #tpu.memory_space<vmem>>, vector<8x2x128xf32>
    %202 = vector.shape_cast %201 : vector<8x2x128xf32> to vector<16x128xf32>
    %c0_96 = arith.constant 0 : index
    %c0_97 = arith.constant 0 : index
    %203 = vector.load %arg6[%c0_96, %c0_97] : memref<128x4xf32, #tpu.memory_space<vmem>>, vector<128x4xf32>
    %cst_98 = arith.constant dense<0.000000e+00> : vector<16x4xf32>
    %204 = tpu.matmul %200, %203, %cst_98 {dimension_numbers = #tpu.dot_dimension_numbers<[1], [0], [0], [1], [0, 0, 1, 1], [], []>} : vector<16x128xf32>, vector<128x4xf32>, vector<16x4xf32> -> vector<16x4xf32>
    %c0_99 = arith.constant 0 : index
    %c0_100 = arith.constant 0 : index
    %205 = vector.load %arg7[%c0_99, %c0_100] : memref<128x4xf32, #tpu.memory_space<vmem>>, vector<128x4xf32>
    %cst_101 = arith.constant dense<0.000000e+00> : vector<16x4xf32>
    %206 = tpu.matmul %202, %205, %cst_101 {dimension_numbers = #tpu.dot_dimension_numbers<[1], [0], [0], [1], [0, 0, 1, 1], [], []>} : vector<16x128xf32>, vector<128x4xf32>, vector<16x4xf32> -> vector<16x4xf32>
    %207 = arith.subf %204, %206 : vector<16x4xf32>
    %c0_102 = arith.constant 0 : index
    %c0_103 = arith.constant 0 : index
    %208 = vector.load %arg8[%c0_102, %c0_103] : memref<4x4xf32, #tpu.memory_space<vmem>>, vector<4x4xf32>
    %cst_104 = arith.constant dense<0.000000e+00> : vector<16x4xf32>
    %209 = tpu.matmul %4, %208, %cst_104 {dimension_numbers = #tpu.dot_dimension_numbers<[1], [0], [0], [1], [0, 0, 1, 1], [], []>} : vector<16x4xf32>, vector<4x4xf32>, vector<16x4xf32> -> vector<16x4xf32>
    %210 = arith.addf %207, %209 : vector<16x4xf32>
    %211 = vector.shape_cast %210 : vector<16x4xf32> to vector<8x2x4xf32>
    %c0_105 = arith.constant 0 : index
    %c0_106 = arith.constant 0 : index
    %c0_107 = arith.constant 0 : index
    %212 = vector.load %arg9[%c0_105, %c0_106, %c0_107] : memref<8x2x4xf32, #tpu.memory_space<vmem>>, vector<8x2x4xf32>
    tpu.vector_store %arg9[%c0_105, %c0_106, %c0_107], %211 {strides = array<i32>} : memref<8x2x4xf32, #tpu.memory_space<vmem>>, vector<8x2x4xf32>,
    return
  }
  func.func @transform_0(%arg0: i32, %arg1: i32) -> (i32, i32, i32) {
    %c0_i32 = arith.constant 0 : i32
    %c0_i32_0 = arith.constant 0 : i32
    return %arg1, %arg0, %c0_i32 : i32, i32, i32
  }
  func.func @transform_1(%arg0: i32, %arg1: i32) -> (i32, i32) {
    %c0_i32 = arith.constant 0 : i32
    %c0_i32_0 = arith.constant 0 : i32
    %c0_i32_1 = arith.constant 0 : i32
    return %c0_i32, %c0_i32_0 : i32, i32
  }
  func.func @transform_2(%arg0: i32, %arg1: i32) -> (i32, i32) {
    %c0_i32 = arith.constant 0 : i32
    %c0_i32_0 = arith.constant 0 : i32
    %c0_i32_1 = arith.constant 0 : i32
    return %c0_i32, %c0_i32_0 : i32, i32
  }
  func.func @transform_3(%arg0: i32, %arg1: i32) -> (i32, i32) {
    %c0_i32 = arith.constant 0 : i32
    %c0_i32_0 = arith.constant 0 : i32
    %c0_i32_1 = arith.constant 0 : i32
    return %c0_i32, %c0_i32_0 : i32, i32
  }
  func.func @transform_4(%arg0: i32, %arg1: i32) -> (i32, i32) {
    %c0_i32 = arith.constant 0 : i32
    %c0_i32_0 = arith.constant 0 : i32
    %c0_i32_1 = arith.constant 0 : i32
    return %c0_i32, %c0_i32_0 : i32, i32
  }
  func.func @transform_5(%arg0: i32, %arg1: i32) -> (i32, i32) {
    %c0_i32 = arith.constant 0 : i32
    %c0_i32_0 = arith.constant 0 : i32
    %c0_i32_1 = arith.constant 0 : i32
    return %c0_i32, %c0_i32_0 : i32, i32
  }
  func.func @transform_6(%arg0: i32, %arg1: i32) -> (i32, i32) {
    %c0_i32 = arith.constant 0 : i32
    %c0_i32_0 = arith.constant 0 : i32
    %c0_i32_1 = arith.constant 0 : i32
    return %c0_i32, %c0_i32_0 : i32, i32
  }
  func.func @transform_7(%arg0: i32, %arg1: i32) -> (i32, i32, i32) {
    %c0_i32 = arith.constant 0 : i32
    %c0_i32_0 = arith.constant 0 : i32
    return %arg1, %arg0, %c0_i32 : i32, i32, i32
  }
}

</mosaic_0001>

<bundles_post_ra>
// kernel: tpu_custom_call.1
= control target key start
LH: loop header
LB: loop body
LE: loop exit
PB: predicated region body
PF: predicated region fallthrough
CT: control target
= control target key end

     0   :  { %vm88_vm0 = vcmask 1043456   ;;  %v54_v0 = vlaneseq  ;;  %v1115_v4 = vmov 1983009808   ;;  %vm83_vm1 = vcmask 31744   ;;  %s1412_s1 = inlined_call_operand.vmem [shape: f32[4,128], index: 1, kind: input, shape index: {}]   ;;  %s1413_s2 = inlined_call_operand.vmem [shape: f32[4,128], index: 2, kind: input, shape index: {}]   ;;  %s1414_s0 = inlined_call_operand.vmem [shape: f32[8,2,4], index: 0, kind: input, shape index: {}]   ;;  %s1415_s4 = inlined_call_operand.vmem [shape: f32[128,4], index: 4, kind: input, shape index: {}]   ;;  %s1416_s5 = inlined_call_operand.vmem [shape: f32[128,4], index: 5, kind: input, shape index: {}]   ;;  %s1417_s6 = inlined_call_operand.vmem [shape: f32[4,4], index: 6, kind: input, shape index: {}]   ;;  %s1418_s3 = inlined_call_operand.vmem [shape: f32[2,128], index: 3, kind: input, shape index: {}]   ;;  %s1419_s7 = inlined_call_operand.vmem [shape: f32[8,2,4], index: 7, kind: output, shape index: {}]  }
   0x1   :  { %v40_v1 = vld [vmem:[%s1412_s1] sm:$0xf]  ;;  %v52_v5 = vunpack.c.l.s4 %v1115_v4  ;;  %v34_v7 = vld [vmem:[%s1414_s0 + $0x4] sm:$0x3]  ;;  %v35_v8 = vld [vmem:[%s1414_s0 + $0x6] sm:$0x3] }
   0x2   :  { %v219_v2 = vld [vmem:[%s1413_s2] sm:$0xf]  ;;  %964 = vmatprep.subr.msk.mxu0 %vm88_vm0, %v40_v1  ;;  %v50_v10 = vcombine.low %v34_v7, %v35_v8  ;;  %v55_v12 = vshrl.u32 %v54_v0, 7  ;;  %v36_v13 = vld [vmem:[%s1414_s0 + $0x8] sm:$0x3]  ;;  %v1116_v26 = vmov 0.0  }
   0x3   :  { %v32_v3 = vld [vmem:[%s1414_s0] sm:$0x3]  ;;  %969 = vmatprep.subr.msk.mxu1 %vm88_vm0, %v219_v2  ;;  %v33_v6 = vld [vmem:[%s1414_s0 + $0x2] sm:$0x3]  ;;  %965 = vmatpush3.msk.msra.mxu0 %vm88_vm0, %v40_v1  ;;  %v53_v11 = vunpack.c.0.s8 %v52_v5  ;;  %v37_v14 = vld [vmem:[%s1414_s0 + $0xa] sm:$0x3] }
   0x4   :  { %v49_v9 = vcombine.low %v32_v3, %v33_v6  ;;  %970 = vmatpush3.msk.msra.mxu1 %vm88_vm0, %v219_v2  ;;  %v38_v15 = vld [vmem:[%s1414_s0 + $0xc] sm:$0x3]  ;;  %v39_v16 = vld [vmem:[%s1414_s0 + $0xe] sm:$0x3]  ;;  %v66_v17 = vcombine.low %v36_v13, %v37_v14  ;;  %30 = vst [vmem:[#allocation2] sm:$0x3] %v1116_v26 }
   0x5   :  { %v1191_v18 = vsub.s32 %v53_v11, %v55_v12  ;;  %v67_v19 = vcombine.low %v38_v15, %v39_v16  ;;  %31 = vst [vmem:[#allocation3] sm:$0x3] %v1116_v26  ;;  %v490_v27 = vld [vmem:[%s1415_s4] sm:$0xff]  ;;  %v491_v28 = vld [vmem:[%s1415_s4 + $0x8] sm:$0xff]  ;;  %v492_v33 = vld [vmem:[%s1415_s4 + $0x10] sm:$0xff]  ;;  %vm887_vm2 = vcmask 25600  }
   0x6   :  { %v625_v29 = vld [vmem:[%s1416_s5] sm:$0xff]  ;;  %v1049_v30 = vpack.c.bf16 %v491_v28, %v490_v27  ;;  %v626_v31 = vld [vmem:[%s1416_s5 + $0x8] sm:$0xff]  ;;  %v493_v34 = vld [vmem:[%s1415_s4 + $0x18] sm:$0xff] }
   0x7   :  { %v57_v20 = vrot.slane %v49_v9, %v1191_v18  ;;  %v64_v21 = vrot.slane %v50_v10, %v1191_v18  ;;  %v74_v22 = vrot.slane %v66_v17, %v1191_v18  ;;  %v81_v23 = vrot.slane %v67_v19, %v1191_v18  ;;  %v627_v35 = vld [vmem:[%s1416_s5 + $0x10] sm:$0xff]  ;;  %v628_v37 = vld [vmem:[%s1416_s5 + $0x18] sm:$0xff]  ;;  %v494_v39 = vld [vmem:[%s1415_s4 + $0x20] sm:$0xff] }
   0x8   :  { %v1081_v32 = vpack.c.bf16 %v626_v31, %v625_v29  ;;  %1050 = vmatprep.subr.bf16.mxu0 %v1049_v30  ;;  %v1053_v36 = vpack.c.bf16 %v493_v34, %v492_v33  ;;  %v1085_v38 = vpack.c.bf16 %v628_v37, %v627_v35  ;;  %v495_v40 = vld [vmem:[%s1415_s4 + $0x28] sm:$0xff]  ;;  %v629_v42 = vld [vmem:[%s1416_s5 + $0x20] sm:$0xff]  ;;  %v496_v45 = vld [vmem:[%s1415_s4 + $0x30] sm:$0xff] }
   0x9   :  { %v1197_v24 = vcombine.low %v57_v20, %v64_v21  ;;  %v1199_v25 = vcombine.low %v74_v22, %v81_v23  ;;  %v1057_v41 = vpack.c.bf16 %v495_v40, %v494_v39  ;;  %v630_v43 = vld [vmem:[%s1416_s5 + $0x28] sm:$0xff]  ;;  %v497_v46 = vld [vmem:[%s1415_s4 + $0x38] sm:$0xff]  ;;  %v631_v47 = vld [vmem:[%s1416_s5 + $0x30] sm:$0xff] }
   0xa   :  { %1082 = vmatprep.subr.bf16.mxu1 %v1081_v32  ;;  %v1089_v44 = vpack.c.bf16 %v630_v43, %v629_v42  ;;  %v1061_v48 = vpack.c.bf16 %v497_v46, %v496_v45  ;;  %v632_v49 = vld [vmem:[%s1416_s5 + $0x38] sm:$0xff]  ;;  %v498_v51 = vld [vmem:[%s1415_s4 + $0x40] sm:$0xff]  ;;  %v499_v52 = vld [vmem:[%s1415_s4 + $0x48] sm:$0xff] }
   0xb   :  { %966 = vmatprep.mubr.msk.f32.mxu0 %vm83_vm1, %v1197_v24  ;;  %971 = vmatprep.mubr.msk.f32.mxu1 %vm83_vm1, %v1197_v24  ;;  %v1093_v50 = vpack.c.bf16 %v632_v49, %v631_v47  ;;  %v633_v53 = vld [vmem:[%s1416_s5 + $0x40] sm:$0xff]  ;;  %v1065_v54 = vpack.c.bf16 %v499_v52, %v498_v51  ;;  %v634_v55 = vld [vmem:[%s1416_s5 + $0x48] sm:$0xff]  ;;  %v500_v57 = vld [vmem:[%s1415_s4 + $0x50] sm:$0xff] }
   0xc   :  { %967 = vmatmul.mubr.msk.f32.vlgmr.msra.gmra.mrb[0].mxu0 %vm83_vm1, %v1199_v25  ;;  %972 = vmatmul.mubr.msk.f32.vlgmr.msra.gmra.mrb[0].mxu1 %vm83_vm1, %v1199_v25  ;;  %v1097_v56 = vpack.c.bf16 %v634_v55, %v633_v53  ;;  %v501_v58 = vld [vmem:[%s1415_s4 + $0x58] sm:$0xff]  ;;  %v635_v59 = vld [vmem:[%s1416_s5 + $0x50] sm:$0xff]  ;;  %v502_v62 = vld [vmem:[%s1415_s4 + $0x60] sm:$0xff] }
   0xd   :  { %1052 = vmatpush3.bf16.msra.mxu0 %v1049_v30  ;;  %1084 = vmatpush3.bf16.msra.mxu1 %v1081_v32  ;;  %v1069_v60 = vpack.c.bf16 %v501_v58, %v500_v57  ;;  %v636_v61 = vld [vmem:[%s1416_s5 + $0x58] sm:$0xff]  ;;  %v503_v63 = vld [vmem:[%s1415_s4 + $0x68] sm:$0xff]  ;;  %v637_v2 = vld [vmem:[%s1416_s5 + $0x60] sm:$0xff] }
   0xe   :  { %1054 = vmatprep.subr.bf16.mxu0 %v1053_v36  ;;  %1086 = vmatprep.subr.bf16.mxu1 %v1085_v38  ;;  %v1101_v0 = vpack.c.bf16 %v636_v61, %v635_v59  ;;  %v1073_v1 = vpack.c.bf16 %v503_v63, %v502_v62  ;;  %v638_v3 = vld [vmem:[%s1416_s5 + $0x68] sm:$0xff]  ;;  %v504_v4 = vld [vmem:[%s1415_s4 + $0x70] sm:$0xff]  ;;  %v505_v6 = vld [vmem:[%s1415_s4 + $0x78] sm:$0xff] }
   0xf   :  { %v1105_v5 = vpack.c.bf16 %v638_v3, %v637_v2  ;;  %v639_v7 = vld [vmem:[%s1416_s5 + $0x70] sm:$0xff]  ;;  %v640_v8 = vld [vmem:[%s1416_s5 + $0x78] sm:$0xff]  ;;  %v1077_v9 = vpack.c.bf16 %v505_v6, %v504_v4  ;;  %v1308_v11 = vld [vmem:[%s1417_s6] sm:$0xf] }
  0x10   :  { %v1109_v10 = vpack.c.bf16 %v640_v8, %v639_v7  ;;  %v1315_v12 = vld [vmem:[%s1418_s3] ss:$0 sm:$0xff]  ;;  %v1320_v13 = vld [vmem:[%s1418_s3 + $0x1] ss:$0 sm:$0xff]  ;;  %v360_v14 = vld [vmem:[#allocation2] sm:$0x3] }
  0x11   :  { %1056 = vmatpush3.bf16.msra.mxu0 %v1053_v36  ;;  %1088 = vmatpush3.bf16.msra.mxu1 %v1085_v38  ;;  %v361_v15 = vld [vmem:[#allocation3] sm:$0x3]  ;;  %v364_v19 = vmul.f32 %v1315_v12, %v360_v14  ;;  %v368_v21 = vmul.f32 %v1320_v13, %v360_v14 }
  0x12   :  { %1058 = vmatprep.subr.bf16.mxu0 %v1057_v41  ;;  %1090 = vmatprep.subr.bf16.mxu1 %v1089_v44  ;;  %v365_v20 = vmul.f32 %v1320_v13, %v361_v15  ;;  %v369_v22 = vmul.f32 %v1315_v12, %v361_v15 }
  0x14   :  { %v366_v46 = vsub.f32 %v364_v19, %v365_v20 }
  0x15   :  { %1060 = vmatpush3.bf16.msra.mxu0 %v1057_v41  ;;  %1092 = vmatpush3.bf16.msra.mxu1 %v1089_v44 }
  0x16   :  { %1062 = vmatprep.subr.bf16.mxu0 %v1061_v48  ;;  %1094 = vmatprep.subr.bf16.mxu1 %v1093_v50 }
  0x19   :  { %1064 = vmatpush3.bf16.msra.mxu0 %v1061_v48  ;;  %1096 = vmatpush3.bf16.msra.mxu1 %v1093_v50  ;;  %v370_v48 = vadd.f32 %v369_v22, %v368_v21 }
  0x1a   :  { %1066 = vmatprep.subr.bf16.mxu0 %v1065_v54  ;;  %1098 = vmatprep.subr.bf16.mxu1 %v1097_v56 }
  0x1d   :  { %1068 = vmatpush3.bf16.msra.mxu0 %v1065_v54  ;;  %1100 = vmatpush3.bf16.msra.mxu1 %v1097_v56 }
  0x1e   :  { %1070 = vmatprep.subr.bf16.mxu0 %v1069_v60  ;;  %1102 = vmatprep.subr.bf16.mxu1 %v1101_v0 }
  0x21   :  { %1072 = vmatpush3.bf16.msra.mxu0 %v1069_v60  ;;  %1104 = vmatpush3.bf16.msra.mxu1 %v1101_v0 }
  0x22   :  { %1074 = vmatprep.subr.bf16.mxu0 %v1073_v1  ;;  %1106 = vmatprep.subr.bf16.mxu1 %v1105_v5 }
  0x25   :  { %1076 = vmatpush3.bf16.msra.mxu0 %v1073_v1  ;;  %1108 = vmatpush3.bf16.msra.mxu1 %v1105_v5 }
  0x26   :  { %1078 = vmatprep.subr.bf16.mxu0 %v1077_v9  ;;  %1110 = vmatprep.subr.bf16.mxu1 %v1109_v10 }
  0x29   :  { %1080 = vmatpush3.bf16.msra.mxu0 %v1077_v9  ;;  %1112 = vmatpush3.bf16.msra.mxu1 %v1109_v10 }
  0x2a   :  { %1044 = vmatprep.subr.msk.mxu0 %vm88_vm0, %v1308_v11 }
  0xdf   :  { %v968_v16 = vpop.f32.mrb[0].mxu0  ;;  %v973_v17 = vpop.f32.mrb[0].mxu1 }
  0xe0   :  { %v186_v23 = vcombine.high %v968_v16, %v968_v16  ;;  %v193_v26 = vrot.slane %v968_v16, %v1191_v18  ;;  %905 = vst.sshfl [vmem:[#allocation4 + $0x8] sm:$0x3 pattern:$0x76325410] %v968_v16  ;;  %v317_v27 = vcombine.high %v973_v17, %v973_v17  ;;  %v324_v28 = vrot.slane %v973_v17, %v1191_v18  ;;  %v158_v29 = vpop.f32.mrb[1].mxu0  ;;  %v289_v30 = vpop.f32.mrb[1].mxu1 }
  0xe1   :  { %912 = vst.sshfl [vmem:[#allocation5 + $0x8] sm:$0x3 pattern:$0x76325410] %v973_v17  ;;  %v169_v31 = vcombine.high %v158_v29, %v158_v29  ;;  %v176_v32 = vrot.slane %v158_v29, %v1191_v18  ;;  %v300_v33 = vcombine.high %v289_v30, %v289_v30  ;;  %v307_v34 = vrot.slane %v289_v30, %v1191_v18 }
  0xe2   :  { %903 = vst.sshfl [vmem:[#allocation4] sm:$0x3 pattern:$0x76325410] %v158_v29  ;;  %v200_v35 = vrot.slane %v186_v23, %v1191_v18  ;;  %v201_v36 = vcombine.high %v193_v26, %v193_v26  ;;  %v331_v37 = vrot.slane %v317_v27, %v1191_v18  ;;  %v332_v38 = vcombine.high %v324_v28, %v324_v28 }
  0xe3   :  { %910 = vst.sshfl [vmem:[#allocation5] sm:$0x3 pattern:$0x76325410] %v289_v30  ;;  %v183_v39 = vrot.slane %v169_v31, %v1191_v18  ;;  %v184_v40 = vcombine.high %v176_v32, %v176_v32  ;;  %v314_v41 = vrot.slane %v300_v33, %v1191_v18  ;;  %v315_v42 = vcombine.high %v307_v34, %v307_v34 }
  0xe4   :  { %906 = vst.sshfl [vmem:[#allocation4 + $0xc] sm:$0x3 pattern:$0x76325410] %v186_v23  ;;  %v202_v43 = vcombine.high %v200_v35, %v200_v35  ;;  %216 = vst [vmem:[#allocation4 + $0xa] sm:$0x3] %v201_v36  ;;  %v333_v44 = vcombine.high %v331_v37, %v331_v37 }
  0xe5   :  { %913 = vst.sshfl [vmem:[#allocation5 + $0xc] sm:$0x3 pattern:$0x76325410] %v317_v27  ;;  %347 = vst [vmem:[#allocation5 + $0xa] sm:$0x3] %v332_v38  ;;  %v185_v45 = vcombine.high %v183_v39, %v183_v39  ;;  %v316_v47 = vcombine.high %v314_v41, %v314_v41 }
  0xe6   :  { %904 = vst.sshfl [vmem:[#allocation4 + $0x4] sm:$0x3 pattern:$0x76325410] %v169_v31  ;;  %212 = vst [vmem:[#allocation4 + $0x2] sm:$0x3] %v184_v40 }
  0xe7   :  { %911 = vst.sshfl [vmem:[#allocation5 + $0x4] sm:$0x3 pattern:$0x76325410] %v300_v33  ;;  %343 = vst [vmem:[#allocation5 + $0x2] sm:$0x3] %v315_v42 }
  0xe8   :  { %218 = vst [vmem:[#allocation4 + $0xe] sm:$0x3] %v202_v43  ;;  %349 = vst [vmem:[#allocation5 + $0xe] sm:$0x3] %v333_v44  ;;  %v417_v31 = vld [vmem:[#allocation4 + $0x8] sm:$0x3] }
  0xe9   :  { %214 = vst [vmem:[#allocation4 + $0x6] sm:$0x3] %v185_v45  ;;  %345 = vst [vmem:[#allocation5 + $0x6] sm:$0x3] %v316_v47  ;;  %v362_v49 = vld [vmem:[#allocation4] sm:$0x3] }
  0xea   :  { %v363_v50 = vld [vmem:[#allocation5] sm:$0x3]  ;;  %v367_v51 = vadd.f32 %v366_v46, %v362_v49  ;;  %v419_v32 = vld [vmem:[#allocation5 + $0x8] sm:$0x3] }
  0xeb   :  { %v371_v52 = vadd.f32 %v370_v48, %v363_v50 }
  0xec   :  { %372 = vst [vmem:[#allocation4] sm:$0x3] %v367_v51  ;;  %v378_v53 = vmul.f32 %v1315_v12, %v367_v51  ;;  %v382_v54 = vmul.f32 %v1320_v13, %v367_v51 }
  0xed   :  { %373 = vst [vmem:[#allocation5] sm:$0x3] %v371_v52  ;;  %v379_v55 = vmul.f32 %v1320_v13, %v371_v52  ;;  %v383_v56 = vmul.f32 %v1315_v12, %v371_v52  ;;  %v375_v59 = vld [vmem:[#allocation4 + $0x2] sm:$0x3]  ;;  %v389_v5 = vld [vmem:[#allocation4 + $0x4] sm:$0x3] }
  0xee   :  { %v377_v60 = vld [vmem:[#allocation5 + $0x2] sm:$0x3]  ;;  %v391_v6 = vld [vmem:[#allocation5 + $0x4] sm:$0x3] }
  0xef   :  { %v380_v57 = vsub.f32 %v378_v53, %v379_v55  ;;  %v384_v58 = vadd.f32 %v383_v56, %v382_v54  ;;  %v431_v53 = vld [vmem:[#allocation4 + $0xa] sm:$0x3]  ;;  %v433_v54 = vld [vmem:[#allocation5 + $0xa] sm:$0x3] }
  0xf0   :  { %v403_v19 = vld [vmem:[#allocation4 + $0x6] sm:$0x3]  ;;  %v405_v20 = vld [vmem:[#allocation5 + $0x6] sm:$0x3] }
  0xf1   :  { %v381_v61 = vadd.f32 %v380_v57, %v375_v59  ;;  %v385_v62 = vadd.f32 %v384_v58, %v377_v60 }
  0xf3   :  { %386 = vst [vmem:[#allocation4 + $0x2] sm:$0x3] %v381_v61  ;;  %387 = vst [vmem:[#allocation5 + $0x2] sm:$0x3] %v385_v62  ;;  %v392_v63 = vmul.f32 %v1315_v12, %v381_v61  ;;  %v393_v0 = vmul.f32 %v1320_v13, %v385_v62  ;;  %v396_v1 = vmul.f32 %v1320_v13, %v381_v61  ;;  %v474_v41 = vld [vmem:[#allocation4] sm:$0x3] }
  0xf4   :  { %v397_v2 = vmul.f32 %v1315_v12, %v385_v62  ;;  %v482_v43 = vld [vmem:[#allocation5] sm:$0x3] }
  0xf5   :  { %v394_v3 = vsub.f32 %v392_v63, %v393_v0 }
  0xf6   :  { %v398_v4 = vadd.f32 %v397_v2, %v396_v1 }
  0xf7   :  { %v395_v7 = vadd.f32 %v394_v3, %v389_v5  ;;  %v445_v5 = vld [vmem:[#allocation4 + $0xc] sm:$0x3] }
  0xf8   :  { %v399_v8 = vadd.f32 %v398_v4, %v391_v6  ;;  %v447_v6 = vld [vmem:[#allocation5 + $0xc] sm:$0x3] }
  0xf9   :  { %400 = vst [vmem:[#allocation4 + $0x4] sm:$0x3] %v395_v7  ;;  %v406_v9 = vmul.f32 %v1315_v12, %v395_v7  ;;  %v410_v14 = vmul.f32 %v1320_v13, %v395_v7 }
  0xfa   :  { %401 = vst [vmem:[#allocation5 + $0x4] sm:$0x3] %v399_v8  ;;  %v407_v10 = vmul.f32 %v1320_v13, %v399_v8  ;;  %v411_v15 = vmul.f32 %v1315_v12, %v399_v8  ;;  %v475_v35 = vld [vmem:[#allocation4 + $0x2] sm:$0x3]  ;;  %v483_v36 = vld [vmem:[#allocation5 + $0x2] sm:$0x3] }
  0xfb   :  { %v514_v45 = vcombine.low %v474_v41, %v475_v35  ;;  %v649_v48 = vcombine.low %v482_v43, %v483_v36 }
  0xfc   :  { %v408_v16 = vsub.f32 %v406_v9, %v407_v10  ;;  %v412_v17 = vadd.f32 %v411_v15, %v410_v14 }
  0xfd   :  { %v522_v59 = vrot.slane %v514_v45, %v1191_v18  ;;  %v657_v60 = vrot.slane %v649_v48, %v1191_v18 }
  0xfe   :  { %v409_v21 = vadd.f32 %v408_v16, %v403_v19  ;;  %v413_v22 = vadd.f32 %v412_v17, %v405_v20  ;;  %v459_v19 = vld [vmem:[#allocation4 + $0xe] sm:$0x3]  ;;  %v461_v20 = vld [vmem:[#allocation5 + $0xe] sm:$0x3] }
 0x100   :  { %414 = vst [vmem:[#allocation4 + $0x6] sm:$0x3] %v409_v21  ;;  %415 = vst [vmem:[#allocation5 + $0x6] sm:$0x3] %v413_v22  ;;  %v420_v23 = vmul.f32 %v1315_v12, %v409_v21  ;;  %v421_v26 = vmul.f32 %v1320_v13, %v413_v22  ;;  %v424_v27 = vmul.f32 %v1320_v13, %v409_v21  ;;  %v476_v42 = vld [vmem:[#allocation4 + $0x4] sm:$0x3] }
 0x101   :  { %v425_v28 = vmul.f32 %v1315_v12, %v413_v22  ;;  %v484_v46 = vld [vmem:[#allocation5 + $0x4] sm:$0x3] }
 0x102   :  { %v422_v29 = vsub.f32 %v420_v23, %v421_v26 }
 0x103   :  { %v426_v30 = vadd.f32 %v425_v28, %v424_v27 }
 0x104   :  { %v423_v33 = vadd.f32 %v422_v29, %v417_v31 }
 0x105   :  { %v427_v34 = vadd.f32 %v426_v30, %v419_v32 }
 0x106   :  { %428 = vst [vmem:[#allocation4 + $0x8] sm:$0x3] %v423_v33  ;;  %v434_v37 = vmul.f32 %v1315_v12, %v423_v33  ;;  %v438_v39 = vmul.f32 %v1320_v13, %v423_v33 }
 0x107   :  { %429 = vst [vmem:[#allocation5 + $0x8] sm:$0x3] %v427_v34  ;;  %v435_v38 = vmul.f32 %v1320_v13, %v427_v34  ;;  %v439_v40 = vmul.f32 %v1315_v12, %v427_v34  ;;  %v477_v44 = vld [vmem:[#allocation4 + $0x6] sm:$0x3]  ;;  %v485_v47 = vld [vmem:[#allocation5 + $0x6] sm:$0x3] }
 0x108   :  { %v515_v51 = vcombine.low %v476_v42, %v477_v44  ;;  %v650_v52 = vcombine.low %v484_v46, %v485_v47 }
 0x109   :  { %v436_v49 = vsub.f32 %v434_v37, %v435_v38  ;;  %v440_v50 = vadd.f32 %v439_v40, %v438_v39 }
 0x10a   :  { %v529_v57 = vrot.slane %v515_v51, %v1191_v18  ;;  %v664_v58 = vrot.slane %v650_v52, %v1191_v18 }
 0x10b   :  { %v437_v55 = vadd.f32 %v436_v49, %v431_v53  ;;  %v441_v56 = vadd.f32 %v440_v50, %v433_v54 }
 0x10c   :  { %v530_v1 = vcombine.low %v522_v59, %v529_v57  ;;  %v665_v2 = vcombine.low %v657_v60, %v664_v58 }
 0x10d   :  { %442 = vst [vmem:[#allocation4 + $0xa] sm:$0x3] %v437_v55  ;;  %443 = vst [vmem:[#allocation5 + $0xa] sm:$0x3] %v441_v56  ;;  %v448_v61 = vmul.f32 %v1315_v12, %v437_v55  ;;  %v449_v62 = vmul.f32 %v1320_v13, %v441_v56  ;;  %v452_v63 = vmul.f32 %v1320_v13, %v437_v55  ;;  %v478_v27 = vld [vmem:[#allocation4 + $0x8] sm:$0x3] }
 0x10e   :  { %v453_v0 = vmul.f32 %v1315_v12, %v441_v56  ;;  %1006 = vmatprep.mubr.f32.mxu0 %v530_v1  ;;  %1041 = vmatprep.mubr.f32.mxu1 %v665_v2  ;;  %v486_v28 = vld [vmem:[#allocation5 + $0x8] sm:$0x3] }
 0x10f   :  { %v450_v3 = vsub.f32 %v448_v61, %v449_v62 }
 0x110   :  { %v454_v4 = vadd.f32 %v453_v0, %v452_v63 }
 0x111   :  { %v451_v7 = vadd.f32 %v450_v3, %v445_v5 }
 0x112   :  { %v455_v8 = vadd.f32 %v454_v4, %v447_v6 }
 0x113   :  { %456 = vst [vmem:[#allocation4 + $0xc] sm:$0x3] %v451_v7  ;;  %v462_v9 = vmul.f32 %v1315_v12, %v451_v7  ;;  %v466_v14 = vmul.f32 %v1320_v13, %v451_v7 }
 0x114   :  { %457 = vst [vmem:[#allocation5 + $0xc] sm:$0x3] %v455_v8  ;;  %v463_v10 = vmul.f32 %v1320_v13, %v455_v8  ;;  %v467_v15 = vmul.f32 %v1315_v12, %v455_v8  ;;  %v479_v23 = vld [vmem:[#allocation4 + $0xa] sm:$0x3]  ;;  %v487_v26 = vld [vmem:[#allocation5 + $0xa] sm:$0x3] }
 0x115   :  { %v531_v30 = vcombine.low %v478_v27, %v479_v23  ;;  %v666_v31 = vcombine.low %v486_v28, %v487_v26 }
 0x116   :  { %v464_v16 = vsub.f32 %v462_v9, %v463_v10  ;;  %v468_v17 = vadd.f32 %v467_v15, %v466_v14 }
 0x117   :  { %v539_v35 = vrot.slane %v531_v30, %v1191_v18  ;;  %v674_v37 = vrot.slane %v666_v31, %v1191_v18 }
 0x118   :  { %v465_v21 = vadd.f32 %v464_v16, %v459_v19  ;;  %v469_v22 = vadd.f32 %v468_v17, %v461_v20 }
 0x11a   :  { %472 = vst [vmem:[#allocation2] sm:$0x3] %v465_v21  ;;  %473 = vst [vmem:[#allocation3] sm:$0x3] %v469_v22  ;;  %v480_v29 = vld [vmem:[#allocation4 + $0xc] sm:$0x3] }
 0x11b   :  { %470 = vst [vmem:[#allocation4 + $0xe] sm:$0x3] %v465_v21  ;;  %471 = vst [vmem:[#allocation5 + $0xe] sm:$0x3] %v469_v22  ;;  %v488_v32 = vld [vmem:[#allocation5 + $0xc] sm:$0x3] }
 0x122   :  { %v481_v13 = vld [vmem:[#allocation4 + $0xe] sm:$0x3]  ;;  %v489_v12 = vld [vmem:[#allocation5 + $0xe] sm:$0x3] }
 0x123   :  { %v532_v33 = vcombine.low %v480_v29, %v481_v13  ;;  %v667_v34 = vcombine.low %v488_v32, %v489_v12 }
 0x125   :  { %v546_v36 = vrot.slane %v532_v33, %v1191_v18  ;;  %v681_v38 = vrot.slane %v667_v34, %v1191_v18 }
 0x127   :  { %v547_v39 = vcombine.low %v539_v35, %v546_v36  ;;  %v682_v40 = vcombine.low %v674_v37, %v681_v38 }
 0x129   :  { %1007 = vmatmul.mubr.f32.vlgmr.msra.gmra.mrb[2].mxu0 %v547_v39  ;;  %1042 = vmatmul.mubr.f32.vlgmr.msra.gmra.mrb[2].mxu1 %v682_v40 }
 0x12a   :  { %1045 = vmatpush3.msk.msra.mxu0 %vm88_vm0, %v1308_v11  ;;  %1046 = vmatprep.mubr.msk.f32.mxu0 %vm83_vm1, %v1197_v24 }
 0x12d   :  { %1047 = vmatmul.mubr.msk.f32.vlgmr.msra.gmra.mrb[4].mxu0 %vm83_vm1, %v1199_v25 }
 0x1fc   :  { %v1008_v41 = vpop.f32.mrb[2].mxu0  ;;  %v1043_v42 = vpop.f32.mrb[2].mxu1 }
 0x1fd   :  { %v761_v43 = vsub.f32 %v1008_v41, %v1043_v42  ;;  %v616_v44 = vpop.f32.mrb[3].mxu0  ;;  %v751_v45 = vpop.f32.mrb[3].mxu1 }
 0x1fe   :  { %v760_v46 = vsub.f32 %v616_v44, %v751_v45 }
 0x200   :  { %v1048_v47 = vpop.f32.mrb[4].mxu0 }
 0x201   :  { %v842_v48 = vadd.f32 %v1048_v47, %v761_v43  ;;  %v832_v49 = vpop.f32.mrb[5].mxu0 }
 0x202   :  { %v841_v50 = vadd.f32 %v832_v49, %v760_v46 }
 0x203   :  { %v862_v51 = vcombine.high %v842_v48, %v842_v48  ;;  %v869_v11 = vrot.slane %v842_v48, %v1191_v18 }
 0x204   :  { %v845_v52 = vcombine.high %v841_v50, %v841_v50  ;;  %v852_v24 = vrot.slane %v841_v50, %v1191_v18 }
 0x205   :  { %v876_v53 = vrot.slane %v862_v51, %v1191_v18  ;;  %v877_v25 = vcombine.high %v869_v11, %v869_v11  ;;  %892 = vst.msk [vmem:[%s1419_s7 + $0x8] sm:$0x3] %vm887_vm2, %v869_v11 }
 0x206   :  { %v859_v54 = vrot.slane %v845_v52, %v1191_v18  ;;  %v860_v55 = vcombine.high %v852_v24, %v852_v24  ;;  %888 = vst.msk [vmem:[%s1419_s7] sm:$0x3] %vm887_vm2, %v852_v24 }
 0x207   :  { %v878_v56 = vcombine.high %v876_v53, %v876_v53  ;;  %893 = vst.msk [vmem:[%s1419_s7 + $0xa] sm:$0x3] %vm887_vm2, %v877_v25  ;;  %894 = vst.msk [vmem:[%s1419_s7 + $0xc] sm:$0x3] %vm887_vm2, %v876_v53 }
 0x208   :  { %v861_v57 = vcombine.high %v859_v54, %v859_v54  ;;  %889 = vst.msk [vmem:[%s1419_s7 + $0x2] sm:$0x3] %vm887_vm2, %v860_v55  ;;  %890 = vst.msk [vmem:[%s1419_s7 + $0x4] sm:$0x3] %vm887_vm2, %v859_v54 }
 0x209   :  { %895 = vst.msk [vmem:[%s1419_s7 + $0xe] sm:$0x3] %vm887_vm2, %v878_v56 }
 0x20a   :  { %891 = vst.msk [vmem:[%s1419_s7 + $0x6] sm:$0x3] %vm887_vm2, %v861_v57 }

</bundles_post_ra>
